<compile_context>
chip_gen: v7x
topology: tpu7x:2x2x1
jax: 0.10.0
libtpu: 0.0.40
codegen_flags: <defaults>
</compile_context>

<pallas_src>
import jax
import jax.numpy as jnp
from jax.experimental import pallas as pl
from jax.experimental.pallas import tpu as pltpu

_LANES = 128       # lane width: pad hidden and output feature dims to this
_SUBLANES = 8      # sublane granularity for batch tiles
_MAX_TB = 512      # default batch tile (rows); amortizes per-grid-step overhead


def _round_up(n: int, m: int) -> int:
    return (n + m - 1) // m * m


def nn1_kernel(x_ref, w1_ref, b1_ref, w2_ref, b2_ref, o_ref):
    # fc1 + ReLU (hidden dim padded to 128 lanes; padded columns stay 0)
    x = x_ref[...]                                       # (TB, D_in)
    h = jnp.dot(x, w1_ref[...],
                preferred_element_type=jnp.float32)      # (TB, H_pad)
    h = jnp.maximum(h + b1_ref[...], 0.0)                # ReLU, broadcast (1, H_pad)
    # fc2 (output dim padded to 128 lanes -> unmasked lane-dense store)
    y = jnp.dot(h, w2_ref[...],
                preferred_element_type=jnp.float32)      # (TB, Dout_pad)
    o_ref[...] = (y + b2_ref[...]).astype(o_ref.dtype)


def nn1_forward(x, w1, b1, w2, b2):
    """Forward pass of NN1.

    x:  (B, D_in)   float32
    w1: (D_in, H)   float32   (transposed PyTorch fc1.weight)
    b1: (H,)        float32
    w2: (H, D_out)  float32   (transposed PyTorch fc2.weight)
    b2: (D_out,)    float32
    returns (B, D_out) float32
    """
    B, D_in = x.shape
    H = w1.shape[1]
    D_out = w2.shape[1]

    H_pad = _round_up(H, _LANES)
    Dout_pad = _round_up(D_out, _LANES)

    # Batch tiling: tile rows (multiple of 8), pad batch to a whole number of tiles.
    TB = min(_MAX_TB, _round_up(B, _SUBLANES))
    B_pad = _round_up(B, TB)

    # Zero-pad operands (inert padding: padded hidden units produce relu(0)=0,
    # padded output columns are exactly 0 and sliced away below).
    x_p = jnp.pad(x, ((0, B_pad - B), (0, 0)))
    w1_p = jnp.pad(w1, ((0, 0), (0, H_pad - H)))
    b1_p = jnp.pad(b1, ((0, H_pad - H),)).reshape(1, H_pad)
    w2_p = jnp.pad(w2, ((0, H_pad - H), (0, Dout_pad - D_out)))
    b2_p = jnp.pad(b2, ((0, Dout_pad - D_out),)).reshape(1, Dout_pad)

    grid = (B_pad // TB,)

    cost = pl.CostEstimate(
        flops=2 * B_pad * (D_in * H_pad + H_pad * Dout_pad),
        transcendentals=0,
        bytes_accessed=4 * (B_pad * D_in + B_pad * Dout_pad
                            + D_in * H_pad + H_pad
                            + H_pad * Dout_pad + Dout_pad),
    )

    out_padded = pl.pallas_call(
        nn1_kernel,
        out_shape=jax.ShapeDtypeStruct((B_pad, Dout_pad), jnp.float32),
        grid=grid,
        in_specs=[
            # x: tiled along batch, double-buffered by the pipeline.
            pl.BlockSpec((TB, D_in), lambda i: (i, 0)),
            # Weights / biases: whole-array blocks, constant index_map ->
            # DMA'd once and kept VMEM-resident across grid steps.
            pl.BlockSpec((D_in, H_pad), lambda i: (0, 0)),
            pl.BlockSpec((1, H_pad), lambda i: (0, 0)),
            pl.BlockSpec((H_pad, Dout_pad), lambda i: (0, 0)),
            pl.BlockSpec((1, Dout_pad), lambda i: (0, 0)),
        ],
        out_specs=pl.BlockSpec((TB, Dout_pad), lambda i: (i, 0)),
        compiler_params=pltpu.CompilerParams(
            dimension_semantics=("parallel",),  # batch tiles are independent (v7x 2 TCs)
        ),
        cost_estimate=cost,
    )(x_p, w1_p, b1_p, w2_p, b2_p)

    return out_padded[:B, :D_out]


nn1_forward_jit = jax.jit(nn1_forward)


def init_nn1_params(key, input_size, output_size, hidden=10):
    """Deterministic PyTorch-style init: U(-1/sqrt(fan_in), 1/sqrt(fan_in))."""
    k1, k2, k3, k4 = jax.random.split(key, 4)
    bound1 = 1.0 / jnp.sqrt(jnp.float32(input_size))
    bound2 = 1.0 / jnp.sqrt(jnp.float32(hidden))
    # Stored already transposed: (in_features, out_features)
    w1 = jax.random.uniform(k1, (input_size, hidden), jnp.float32, -bound1, bound1)
    b1 = jax.random.uniform(k2, (hidden,), jnp.float32, -bound1, bound1)
    w2 = jax.random.uniform(k3, (hidden, output_size), jnp.float32, -bound2, bound2)
    b2 = jax.random.uniform(k4, (output_size,), jnp.float32, -bound2, bound2)
    return w1, b1, w2, b2


if __name__ == "__main__":
    input_size = 16
    output_size = 4
    batch = 8

    key = jax.random.PRNGKey(0)
    kx, kp = jax.random.split(key)
    x = jax.random.normal(kx, (batch, input_size), jnp.float32)
    w1, b1, w2, b2 = init_nn1_params(kp, input_size, output_size)

    out = nn1_forward_jit(x, w1, b1, w2, b2)
    out = jax.block_until_ready(out)

    # Reference check in plain JAX (same math as the PyTorch forward).
    ref = jnp.maximum(x @ w1 + b1[None, :], 0.0) @ w2 + b2[None, :]
    assert out.shape == (batch, output_size)
    assert jnp.allclose(out, ref, atol=1e-5, rtol=1e-5)

    # Also exercise a batch that does not divide the tile size evenly.
    x2 = jax.random.normal(kx, (1037, input_size), jnp.float32)
    out2 = jax.block_until_ready(nn1_forward_jit(x2, w1, b1, w2, b2))
    ref2 = jnp.maximum(x2 @ w1 + b1[None, :], 0.0) @ w2 + b2[None, :]
    assert out2.shape == (1037, output_size)
    assert jnp.allclose(out2, ref2, atol=1e-5, rtol=1e-5)

    print("KERNEL_OK")
</pallas_src>

<mosaic_0001>
module attributes {stable_mosaic.version = 11 : i64} {
  func.func @nn1_kernel(%arg0: i32, %arg1: memref<8x16xf32, #tpu.memory_space<vmem>>, %arg2: memref<16x128xf32, #tpu.memory_space<vmem>>, %arg3: memref<1x128xf32, #tpu.memory_space<vmem>>, %arg4: memref<128x128xf32, #tpu.memory_space<vmem>>, %arg5: memref<1x128xf32, #tpu.memory_space<vmem>>, %arg6: memref<8x128xf32, #tpu.memory_space<vmem>>) attributes {dimension_semantics = [#tpu.dimension_semantics<parallel>], iteration_bounds = array<i64: 1>, scalar_prefetch = 0 : i64, scratch_operands = 0 : i64, tpu.core_type = #tpu.core_type<tc>, window_params = [{transform_indices = @transform_0, window_bounds = array<i64: 8, 16>}, {pipeline_mode = #tpu.pipeline_mode<synchronous>, transform_indices = @transform_1, window_bounds = array<i64: 16, 128>}, {pipeline_mode = #tpu.pipeline_mode<synchronous>, transform_indices = @transform_2, window_bounds = array<i64: 1, 128>}, {pipeline_mode = #tpu.pipeline_mode<synchronous>, transform_indices = @transform_3, window_bounds = array<i64: 128, 128>}, {pipeline_mode = #tpu.pipeline_mode<synchronous>, transform_indices = @transform_4, window_bounds = array<i64: 1, 128>}, {transform_indices = @transform_5, window_bounds = array<i64: 8, 128>}]} {
    %c0 = arith.constant 0 : index
    %c0_0 = arith.constant 0 : index
    %0 = vector.load %arg1[%c0, %c0_0] : memref<8x16xf32, #tpu.memory_space<vmem>>, vector<8x16xf32>
    %c0_1 = arith.constant 0 : index
    %c0_2 = arith.constant 0 : index
    %1 = vector.load %arg2[%c0_1, %c0_2] : memref<16x128xf32, #tpu.memory_space<vmem>>, vector<16x128xf32>
    %cst = arith.constant dense<0.000000e+00> : vector<8x128xf32>
    %2 = tpu.matmul %0, %1, %cst {dimension_numbers = #tpu.dot_dimension_numbers<[1], [0], [0], [1], [0, 0, 1, 1], [], []>} : vector<8x16xf32>, vector<16x128xf32>, vector<8x128xf32> -> vector<8x128xf32>
    %c0_3 = arith.constant 0 : index
    %c0_4 = arith.constant 0 : index
    %3 = vector.load %arg3[%c0_3, %c0_4] : memref<1x128xf32, #tpu.memory_space<vmem>>, vector<1x128xf32>
    %4 = vector.broadcast %3 : vector<1x128xf32> to vector<8x128xf32>
    %5 = arith.addf %2, %4 : vector<8x128xf32>
    %cst_5 = arith.constant 0.000000e+00 : f32
    %6 = vector.broadcast %cst_5 : f32 to vector<8x128xf32>
    %7 = arith.maximumf %5, %6 : vector<8x128xf32>
    %c0_6 = arith.constant 0 : index
    %c0_7 = arith.constant 0 : index
    %8 = vector.load %arg4[%c0_6, %c0_7] : memref<128x128xf32, #tpu.memory_space<vmem>>, vector<128x128xf32>
    %cst_8 = arith.constant dense<0.000000e+00> : vector<8x128xf32>
    %9 = tpu.matmul %7, %8, %cst_8 {dimension_numbers = #tpu.dot_dimension_numbers<[1], [0], [0], [1], [0, 0, 1, 1], [], []>} : vector<8x128xf32>, vector<128x128xf32>, vector<8x128xf32> -> vector<8x128xf32>
    %c0_9 = arith.constant 0 : index
    %c0_10 = arith.constant 0 : index
    %10 = vector.load %arg5[%c0_9, %c0_10] : memref<1x128xf32, #tpu.memory_space<vmem>>, vector<1x128xf32>
    %11 = vector.broadcast %10 : vector<1x128xf32> to vector<8x128xf32>
    %12 = arith.addf %9, %11 : vector<8x128xf32>
    %c0_11 = arith.constant 0 : index
    %c0_12 = arith.constant 0 : index
    %13 = vector.load %arg6[%c0_11, %c0_12] : memref<8x128xf32, #tpu.memory_space<vmem>>, vector<8x128xf32>
    tpu.vector_store %arg6[%c0_11, %c0_12], %12 {strides = array<i32>} : memref<8x128xf32, #tpu.memory_space<vmem>>, vector<8x128xf32>,
    return
  }
  func.func @transform_0(%arg0: i32) -> (i32, i32) {
    %c0_i32 = arith.constant 0 : i32
    %c0_i32_0 = arith.constant 0 : i32
    return %arg0, %c0_i32 : i32, i32
  }
  func.func @transform_1(%arg0: i32) -> (i32, i32) {
    %c0_i32 = arith.constant 0 : i32
    %c0_i32_0 = arith.constant 0 : i32
    %c0_i32_1 = arith.constant 0 : i32
    return %c0_i32, %c0_i32_0 : i32, i32
  }
  func.func @transform_2(%arg0: i32) -> (i32, i32) {
    %c0_i32 = arith.constant 0 : i32
    %c0_i32_0 = arith.constant 0 : i32
    %c0_i32_1 = arith.constant 0 : i32
    return %c0_i32, %c0_i32_0 : i32, i32
  }
  func.func @transform_3(%arg0: i32) -> (i32, i32) {
    %c0_i32 = arith.constant 0 : i32
    %c0_i32_0 = arith.constant 0 : i32
    %c0_i32_1 = arith.constant 0 : i32
    return %c0_i32, %c0_i32_0 : i32, i32
  }
  func.func @transform_4(%arg0: i32) -> (i32, i32) {
    %c0_i32 = arith.constant 0 : i32
    %c0_i32_0 = arith.constant 0 : i32
    %c0_i32_1 = arith.constant 0 : i32
    return %c0_i32, %c0_i32_0 : i32, i32
  }
  func.func @transform_5(%arg0: i32) -> (i32, i32) {
    %c0_i32 = arith.constant 0 : i32
    %c0_i32_0 = arith.constant 0 : i32
    return %arg0, %c0_i32 : i32, i32
  }
}

</mosaic_0001>

<bundles_post_ra>
// kernel: nn1_forward.1
= control target key start
LH: loop header
LB: loop body
LE: loop exit
PB: predicated region body
PF: predicated region fallthrough
CT: control target
= control target key end

     0   :  { %v298_v0 = vmov 0.0|0.0   ;;  %vm299_vm0 = vmmov 0   ;;  %v300_v3 = vmov 0.0   ;;  %vm30_vm1 = vcmask 130048   ;;  %s397_s1 = inlined_call_operand.vmem [shape: f32[16,128], index: 1, kind: input, shape index: {}]   ;;  %s398_s3 = inlined_call_operand.vmem [shape: f32[128,128], index: 3, kind: input, shape index: {}]   ;;  %s399_s0 = inlined_call_operand.vmem [shape: f32[8,16], index: 0, kind: input, shape index: {}]   ;;  %s400_s2 = inlined_call_operand.vmem [shape: f32[1,128], index: 2, kind: input, shape index: {}]   ;;  %s401_s4 = inlined_call_operand.vmem [shape: f32[1,128], index: 4, kind: input, shape index: {}]   ;;  %s402_s5 = inlined_call_operand.vmem [shape: f32[8,128], index: 5, kind: output, shape index: {}]  }
   0x1   :  { %268 = vmatprep.subr.bf16.mxu0 %v298_v0  ;;  %v21_v1 = vld [vmem:[%s397_s1] sm:$0xff]  ;;  %v22_v2 = vld [vmem:[%s397_s1 + $0x8] sm:$0xff]  ;;  %230 = vmatprep.mubr.msk.f32.mxu0 %vm299_vm0, %v300_v3  ;;  %v107_v7 = vld [vmem:[%s398_s3 + $0x10] sm:$0xff] }
   0x2   :  { %v269_v4 = vpack.c.bf16 %v22_v2, %v21_v1  ;;  %271 = vmatprep.subr.bf16.mxu1 %v298_v0  ;;  %v105_v5 = vld [vmem:[%s398_s3] sm:$0xff]  ;;  %v106_v6 = vld [vmem:[%s398_s3 + $0x8] sm:$0xff]  ;;  %265 = vmatprep.mubr.msk.f32.mxu1 %vm299_vm0, %v300_v3  ;;  %v108_v9 = vld [vmem:[%s398_s3 + $0x18] sm:$0xff] }
   0x3   :  { %v272_v8 = vpack.c.bf16 %v106_v6, %v105_v5  ;;  %v20_v10 = vld [vmem:[%s399_s0] sm:$0xff]  ;;  %v275_v11 = vpack.c.bf16 %v108_v9, %v107_v7  ;;  %v110_v13 = vld [vmem:[%s398_s3 + $0x28] sm:$0xff]  ;;  %v111_v15 = vld [vmem:[%s398_s3 + $0x30] sm:$0xff] }
   0x4   :  { %270 = vmatpush3.bf16.msra.mxu0 %v269_v4  ;;  %v109_v12 = vld [vmem:[%s398_s3 + $0x20] sm:$0xff]  ;;  %v112_v16 = vld [vmem:[%s398_s3 + $0x38] sm:$0xff]  ;;  %v114_v19 = vld [vmem:[%s398_s3 + $0x48] sm:$0xff] }
   0x5   :  { %273 = vmatpush3.bf16.msra.mxu1 %v272_v8  ;;  %v278_v14 = vpack.c.bf16 %v110_v13, %v109_v12  ;;  %v281_v17 = vpack.c.bf16 %v112_v16, %v111_v15  ;;  %v113_v18 = vld [vmem:[%s398_s3 + $0x40] sm:$0xff]  ;;  %v115_v21 = vld [vmem:[%s398_s3 + $0x50] sm:$0xff]  ;;  %v116_v22 = vld [vmem:[%s398_s3 + $0x58] sm:$0xff] }
   0x6   :  { %274 = vmatprep.subr.bf16.mxu1 %v298_v0  ;;  %v284_v20 = vpack.c.bf16 %v114_v19, %v113_v18  ;;  %v287_v23 = vpack.c.bf16 %v116_v22, %v115_v21  ;;  %v117_v24 = vld [vmem:[%s398_s3 + $0x60] sm:$0xff]  ;;  %v118_v25 = vld [vmem:[%s398_s3 + $0x68] sm:$0xff]  ;;  %v119_v27 = vld [vmem:[%s398_s3 + $0x70] sm:$0xff] }
   0x7   :  { %231 = vmatmul.mubr.msk.f32.vlgmr.msra.gmra.mrb[0].mxu0 %vm30_vm1, %v20_v10  ;;  %v290_v26 = vpack.c.bf16 %v118_v25, %v117_v24  ;;  %v120_v28 = vld [vmem:[%s398_s3 + $0x78] sm:$0xff]  ;;  %v203_v30 = vld [vmem:[%s400_s2] ss:$0 sm:$0xff] }
   0x8   :  { %v293_v29 = vpack.c.bf16 %v120_v28, %v119_v27  ;;  %v205_v35 = vld [vmem:[%s401_s4] ss:$0 sm:$0xff] }
   0x9   :  { %276 = vmatpush3.bf16.msra.mxu1 %v275_v11 }
   0xa   :  { %277 = vmatprep.subr.bf16.mxu1 %v298_v0 }
   0xd   :  { %279 = vmatpush3.bf16.msra.mxu1 %v278_v14 }
   0xe   :  { %280 = vmatprep.subr.bf16.mxu1 %v298_v0 }
  0x11   :  { %282 = vmatpush3.bf16.msra.mxu1 %v281_v17 }
  0x12   :  { %283 = vmatprep.subr.bf16.mxu1 %v298_v0 }
  0x15   :  { %285 = vmatpush3.bf16.msra.mxu1 %v284_v20 }
  0x16   :  { %286 = vmatprep.subr.bf16.mxu1 %v298_v0 }
  0x19   :  { %288 = vmatpush3.bf16.msra.mxu1 %v287_v23 }
  0x1a   :  { %289 = vmatprep.subr.bf16.mxu1 %v298_v0 }
  0x1d   :  { %291 = vmatpush3.bf16.msra.mxu1 %v290_v26 }
  0x1e   :  { %292 = vmatprep.subr.bf16.mxu1 %v298_v0 }
  0x21   :  { %294 = vmatpush3.bf16.msra.mxu1 %v293_v29 }
  0xda   :  { %v100_v31 = vpop.f32.mrb[0].mxu0 }
  0xdb   :  { %v101_v32 = vadd.f32 %v203_v30, %v100_v31  ;;  %v232_v33 = vpop.f32.mrb[1].mxu0 }
  0xdd   :  { %v104_v34 = vmax.f32 %v101_v32, 0.0 }
  0xdf   :  { %266 = vmatmul.mubr.f32.vlgmr.msra.gmra.mrb[0].mxu1 %v104_v34 }
 0x1b2   :  { %v194_v36 = vpop.f32.mrb[0].mxu1 }
 0x1b3   :  { %v195_v37 = vadd.f32 %v205_v35, %v194_v36  ;;  %v267_v38 = vpop.f32.mrb[1].mxu1 }
 0x1b5   :  { %198 = vst [vmem:[%s402_s5] sm:$0xff] %v195_v37 }

</bundles_post_ra>
